<compile_context>
chip_gen: v6e
topology: v6e:2x2x1
jax: 0.10.0
libtpu: 0.0.40
codegen_flags: <defaults>
</compile_context>

<pallas_src>
import numpy as np

import jax
import jax.numpy as jnp
from jax import lax
from jax.experimental import pallas as pl
from jax.experimental.pallas import tpu as pltpu


# ------------------------------ fused kernel --------------------------------


def vgg3_fused_kernel(x_ref, wc_ref, bc_ref, w1_ref, b1_ref, w2_ref, b2_ref,
                      o_ref):
    # x_ref:  (1, H, W*Cin)        one image, lane index = w*Cin + c
    # wc_ref: (3, W*Cin, W*Cout)   banded conv weight, one slab per kh
    #                              col layout = (w%2)*(Wp*Cout) + (w//2)*Cout + o
    # bc_ref: (1, W*Cout)          conv bias broadcast to the same col layout
    # w1_ref: (Hp*Wp*Cout, hidden) fc1 weight, NCHW-flatten perm folded in
    # b1_ref: (1, hidden)
    # w2_ref: (hidden, classes)
    # b2_ref: (1, classes)
    # o_ref:  (1, 1, classes)
    _, H, _ = x_ref.shape
    WCout = wc_ref.shape[-1]
    half = WCout // 2                       # = Wp * Cout
    Hp = H // 2

    x = x_ref[0]                            # (H, W*Cin), fully lane-dense

    # kh = 0 / kh = 2 row shifts as tiny (H,H) shift-matrix matmuls: keeps the
    # halo handling on the (idle) MXU, no padded scratch, no unaligned stores.
    ri = lax.broadcasted_iota(jnp.int32, (H, H), 0)
    ci = lax.broadcasted_iota(jnp.int32, (H, H), 1)
    s_up = (ci == ri - 1).astype(jnp.float32)    # (s_up @ x)[h] = x[h-1], 0 at h=0
    s_dn = (ci == ri + 1).astype(jnp.float32)    # (s_dn @ x)[h] = x[h+1], 0 at h=H-1
    x_up = jnp.dot(s_up, x, preferred_element_type=jnp.float32)
    x_dn = jnp.dot(s_dn, x, preferred_element_type=jnp.float32)

    # --- Conv2d(Cin, Cout, 3, padding=1) + ReLU ------------------------------
    # Three accumulated lane-dense matmuls (one per kh) against block-banded
    # weights; width zero-padding is already folded into the weight bands.
    acc = jnp.dot(x_up, wc_ref[0], preferred_element_type=jnp.float32)
    acc = acc + jnp.dot(x, wc_ref[1], preferred_element_type=jnp.float32)
    acc = acc + jnp.dot(x_dn, wc_ref[2], preferred_element_type=jnp.float32)
    acc = jnp.maximum(acc + bc_ref[...], 0.0)          # (H, W*Cout), fused ReLU

    # --- MaxPool2d(2,2), value-resident --------------------------------------
    # Width direction: even-w outputs live in lanes [:half], odd-w in [half:]
    # (that split was baked into the conv weight columns), so the width pool is
    # a single vreg-column max.  Result lane index = wp*Cout + o.
    wpool = jnp.maximum(acc[:, :half], acc[:, half:])   # (H, Wp*Cout) = (16,128)

    # Height direction fused with the flatten: max each row pair and pack the
    # Hp pooled rows lane-dense into one (1, Hp*Wp*Cout) row whose index is
    # hp*(Wp*Cout) + wp*Cout + o  (fc1 weight rows are permuted to match).
    rows = [jnp.maximum(wpool[2 * hp:2 * hp + 1, :],
                        wpool[2 * hp + 1:2 * hp + 2, :]) for hp in range(Hp)]
    hflat = jnp.concatenate(rows, axis=1)               # (1, 1024)

    # --- classifier: fc1 (one K=1024 matmul) + ReLU, then fc2 ----------------
    h1 = jnp.dot(hflat, w1_ref[...], preferred_element_type=jnp.float32)
    h1 = jnp.maximum(h1 + b1_ref[...], 0.0)             # (1, hidden)
    logits = jnp.dot(h1, w2_ref[...], preferred_element_type=jnp.float32)
    logits = logits + b2_ref[...]                       # (1, classes)
    o_ref[...] = logits.reshape(o_ref.shape).astype(o_ref.dtype)


# ------------------------------ weight re-layout ------------------------------


def prepare_params(params, H, W):
    """One-time weight re-layout (host side, OUTSIDE the jitted forward)."""
    conv_w = np.asarray(params["conv_w"])        # (Cout, Cin, 3, 3) OIHW
    conv_b = np.asarray(params["conv_b"])
    fc1_w = np.asarray(params["fc1_w"])          # (hidden, Cout*Hp*Wp)
    fc1_b = np.asarray(params["fc1_b"])
    fc2_w = np.asarray(params["fc2_w"])          # (classes, hidden)
    fc2_b = np.asarray(params["fc2_b"])

    Cout, Cin, KH, KW = conv_w.shape
    Hp, Wp = H // 2, W // 2
    hidden = fc1_w.shape[0]
    classes = fc2_w.shape[0]
    WCin, WCout = W * Cin, W * Cout
    half = Wp * Cout

    wt = np.transpose(conv_w, (2, 3, 1, 0))      # (kh, kw, cin, cout)

    # Block-banded conv weight, one (W*Cin, W*Cout) slab per kh.
    # Output column layout: col(w, o) = (w % 2)*(Wp*Cout) + (w // 2)*Cout + o,
    # so the width-direction 2x2 pool in the kernel is max(cols[:half], cols[half:]).
    # Width zero-padding is handled by skipping out-of-range kw taps.
    wc = np.zeros((KH, WCin, WCout), np.float32)
    bc = np.zeros((1, WCout), np.float32)
    for w_out in range(W):
        col0 = (w_out % 2) * half + (w_out // 2) * Cout
        bc[0, col0:col0 + Cout] = conv_b
        for kh in range(KH):
            for kw in range(KW):
                w_in = w_out + kw - 1
                if 0 <= w_in < W:
                    wc[kh, w_in * Cin:(w_in + 1) * Cin,
                       col0:col0 + Cout] = wt[kh, kw]

    # fc1 weight with the NCHW flatten permutation folded in: PyTorch flattens
    # as k = o*Hp*Wp + hp*Wp + wp; the kernel's flattened row uses
    # k' = hp*(Wp*Cout) + wp*Cout + o.
    w1 = fc1_w.reshape(hidden, Cout, Hp, Wp)               # [j, o, hp, wp]
    w1 = np.transpose(w1, (2, 3, 1, 0)).reshape(Hp * Wp * Cout, hidden)

    return {
        "wc": jnp.asarray(wc),
        "bc": jnp.asarray(bc),
        "w1": jnp.asarray(w1),
        "b1": jnp.asarray(fc1_b.reshape(1, hidden).astype(np.float32)),
        "w2": jnp.asarray(np.ascontiguousarray(fc2_w.T).astype(np.float32)),
        "b2": jnp.asarray(fc2_b.reshape(1, classes).astype(np.float32)),
    }


# ------------------------------ forward wrapper -------------------------------


def vgg3_forward(prep, x_nchw):
    """features[target_layer+1:] -> flatten -> classifier, one fused kernel."""
    N, Cin, H, W = x_nchw.shape
    WCin = W * Cin
    WCout = prep["wc"].shape[-1]
    hidden = prep["b1"].shape[-1]
    classes = prep["b2"].shape[-1]
    Hp, Wp = H // 2, W // 2
    flat = Hp * Wp * (WCout // W)

    # NCHW -> lane-dense (N, H, W*Cin) rows (w*Cin + c on lanes).
    x = jnp.transpose(x_nchw, (0, 2, 3, 1)).reshape(N, H, WCin)

    flops = N * (2 * 2 * H * H * WCin            # two (H,H) shift matmuls
                 + 3 * 2 * H * WCin * WCout      # banded conv matmuls
                 + 2 * flat * hidden             # fc1
                 + 2 * hidden * classes)         # fc2
    bytes_accessed = 4 * (x.size + prep["wc"].size + prep["bc"].size
                          + prep["w1"].size + prep["b1"].size
                          + prep["w2"].size + prep["b2"].size + N * classes)

    out = pl.pallas_call(
        vgg3_fused_kernel,
        out_shape=jax.ShapeDtypeStruct((N, 1, classes), x.dtype),
        grid=(N,),
        in_specs=[
            pl.BlockSpec((1, H, WCin), lambda i: (i, 0, 0)),       # activation
            pl.BlockSpec((3, WCin, WCout), lambda i: (0, 0, 0)),   # conv bands
            pl.BlockSpec((1, WCout), lambda i: (0, 0)),            # conv bias
            pl.BlockSpec((flat, hidden), lambda i: (0, 0)),        # fc1 w
            pl.BlockSpec((1, hidden), lambda i: (0, 0)),           # fc1 b
            pl.BlockSpec((hidden, classes), lambda i: (0, 0)),     # fc2 w
            pl.BlockSpec((1, classes), lambda i: (0, 0)),          # fc2 b
        ],
        out_specs=pl.BlockSpec((1, 1, classes), lambda i: (i, 0, 0)),
        compiler_params=pltpu.CompilerParams(
            dimension_semantics=("parallel",),          # 2 TCs on v7x
            vmem_limit_bytes=32 * 1024 * 1024),
        cost_estimate=pl.CostEstimate(flops=int(flops), transcendentals=0,
                                      bytes_accessed=int(bytes_accessed)),
    )(x, prep["wc"], prep["bc"], prep["w1"], prep["b1"], prep["w2"], prep["b2"])

    return out.reshape(N, classes)


# ------------------------------ reference (pure JAX) --------------------------


def vgg3_reference(params, x_nchw):
    w = params["conv_w"]
    y = lax.conv_general_dilated(
        x_nchw, w, window_strides=(1, 1), padding=((1, 1), (1, 1)),
        dimension_numbers=("NCHW", "OIHW", "NCHW"))
    y = jnp.maximum(y + params["conv_b"][None, :, None, None], 0.0)
    y = lax.reduce_window(y, -jnp.inf, lax.max,
                          (1, 1, 2, 2), (1, 1, 2, 2), "VALID")
    out = y.reshape(y.shape[0], -1)
    out = jnp.maximum(out @ params["fc1_w"].T + params["fc1_b"], 0.0)
    out = out @ params["fc2_w"].T + params["fc2_b"]
    return out


# ------------------------------ main ------------------------------------------


if __name__ == "__main__":
    key = jax.random.PRNGKey(0)
    kx, kcw, kcb, k1w, k1b, k2w, k2b = jax.random.split(key, 7)

    N, Cin, H, W = 2, 8, 16, 16
    Cout, hidden, classes = 16, 32, 10
    flat = Cout * (H // 2) * (W // 2)                      # 16 * 8 * 8 = 1024

    params = {
        "conv_w": 0.1 * jax.random.normal(kcw, (Cout, Cin, 3, 3), jnp.float32),
        "conv_b": 0.1 * jax.random.normal(kcb, (Cout,), jnp.float32),
        "fc1_w": 0.05 * jax.random.normal(k1w, (hidden, flat), jnp.float32),
        "fc1_b": 0.05 * jax.random.normal(k1b, (hidden,), jnp.float32),
        "fc2_w": 0.05 * jax.random.normal(k2w, (classes, hidden), jnp.float32),
        "fc2_b": 0.05 * jax.random.normal(k2b, (classes,), jnp.float32),
    }

    # x is the intermediate VGG activation fed to VGG3.forward (NCHW).
    x = jax.random.normal(kx, (N, Cin, H, W), jnp.float32)

    prep = prepare_params(params, H, W)          # one-time weight re-layout
    out = jax.jit(vgg3_forward)(prep, x)
    out = jax.block_until_ready(out)

    ref = vgg3_reference(params, x)
    assert out.shape == (N, classes)
    assert jnp.allclose(out, ref, atol=1e-4, rtol=1e-4), "mismatch vs JAX reference"

    print("KERNEL_OK")
</pallas_src>

<mosaic_0001>
module attributes {stable_mosaic.version = 11 : i64} {
  func.func @vgg3_fused_kernel(%arg0: i32, %arg1: memref<1x16x128xf32, #tpu.memory_space<vmem>>, %arg2: memref<3x128x256xf32, #tpu.memory_space<vmem>>, %arg3: memref<1x256xf32, #tpu.memory_space<vmem>>, %arg4: memref<1024x32xf32, #tpu.memory_space<vmem>>, %arg5: memref<1x32xf32, #tpu.memory_space<vmem>>, %arg6: memref<32x10xf32, #tpu.memory_space<vmem>>, %arg7: memref<1x10xf32, #tpu.memory_space<vmem>>, %arg8: memref<1x1x10xf32, #tpu.memory_space<vmem>>) attributes {dimension_semantics = [#tpu.dimension_semantics<parallel>], iteration_bounds = array<i64: 2>, scalar_prefetch = 0 : i64, scratch_operands = 0 : i64, tpu.core_type = #tpu.core_type<tc>, window_params = [{transform_indices = @transform_0, window_bounds = array<i64: 1, 16, 128>}, {pipeline_mode = #tpu.pipeline_mode<synchronous>, transform_indices = @transform_1, window_bounds = array<i64: 3, 128, 256>}, {pipeline_mode = #tpu.pipeline_mode<synchronous>, transform_indices = @transform_2, window_bounds = array<i64: 1, 256>}, {pipeline_mode = #tpu.pipeline_mode<synchronous>, transform_indices = @transform_3, window_bounds = array<i64: 1024, 32>}, {pipeline_mode = #tpu.pipeline_mode<synchronous>, transform_indices = @transform_4, window_bounds = array<i64: 1, 32>}, {pipeline_mode = #tpu.pipeline_mode<synchronous>, transform_indices = @transform_5, window_bounds = array<i64: 32, 10>}, {pipeline_mode = #tpu.pipeline_mode<synchronous>, transform_indices = @transform_6, window_bounds = array<i64: 1, 10>}, {transform_indices = @transform_7, window_bounds = array<i64: 1, 1, 10>}]} {
    %c0 = arith.constant 0 : index
    %c0_0 = arith.constant 0 : index
    %c0_1 = arith.constant 0 : index
    %0 = vector.load %arg1[%c0, %c0_0, %c0_1] : memref<1x16x128xf32, #tpu.memory_space<vmem>>, vector<1x16x128xf32>
    %1 = vector.shape_cast %0 : vector<1x16x128xf32> to vector<16x128xf32>
    %2 = tpu.iota {dimensions = array<i32: 0>} : vector<16x16xi32>
    %3 = tpu.iota {dimensions = array<i32: 1>} : vector<16x16xi32>
    %c1_i32 = arith.constant 1 : i32
    %4 = vector.broadcast %c1_i32 : i32 to vector<16x16xi32>
    %5 = arith.subi %2, %4 : vector<16x16xi32>
    %6 = arith.cmpi eq, %3, %5 : vector<16x16xi32>
    %7 = arith.extui %6 : vector<16x16xi1> to vector<16x16xi32>
    %8 = arith.sitofp %7 : vector<16x16xi32> to vector<16x16xf32>
    %c1_i32_2 = arith.constant 1 : i32
    %9 = vector.broadcast %c1_i32_2 : i32 to vector<16x16xi32>
    %10 = arith.addi %2, %9 : vector<16x16xi32>
    %11 = arith.cmpi eq, %3, %10 : vector<16x16xi32>
    %12 = arith.extui %11 : vector<16x16xi1> to vector<16x16xi32>
    %13 = arith.sitofp %12 : vector<16x16xi32> to vector<16x16xf32>
    %cst = arith.constant dense<0.000000e+00> : vector<16x128xf32>
    %14 = tpu.matmul %8, %1, %cst {dimension_numbers = #tpu.dot_dimension_numbers<[1], [0], [0], [1], [0, 0, 1, 1], [], []>} : vector<16x16xf32>, vector<16x128xf32>, vector<16x128xf32> -> vector<16x128xf32>
    %cst_3 = arith.constant dense<0.000000e+00> : vector<16x128xf32>
    %15 = tpu.matmul %13, %1, %cst_3 {dimension_numbers = #tpu.dot_dimension_numbers<[1], [0], [0], [1], [0, 0, 1, 1], [], []>} : vector<16x16xf32>, vector<16x128xf32>, vector<16x128xf32> -> vector<16x128xf32>
    %c0_4 = arith.constant 0 : index
    %c0_5 = arith.constant 0 : index
    %c0_6 = arith.constant 0 : index
    %16 = vector.load %arg2[%c0_4, %c0_5, %c0_6] : memref<3x128x256xf32, #tpu.memory_space<vmem>>, vector<1x128x256xf32>
    %17 = vector.shape_cast %16 : vector<1x128x256xf32> to vector<128x256xf32>
    %cst_7 = arith.constant dense<0.000000e+00> : vector<16x256xf32>
    %18 = tpu.matmul %14, %17, %cst_7 {dimension_numbers = #tpu.dot_dimension_numbers<[1], [0], [0], [1], [0, 0, 1, 1], [], []>} : vector<16x128xf32>, vector<128x256xf32>, vector<16x256xf32> -> vector<16x256xf32>
    %c1 = arith.constant 1 : index
    %c0_8 = arith.constant 0 : index
    %c0_9 = arith.constant 0 : index
    %19 = vector.load %arg2[%c1, %c0_8, %c0_9] : memref<3x128x256xf32, #tpu.memory_space<vmem>>, vector<1x128x256xf32>
    %20 = vector.shape_cast %19 : vector<1x128x256xf32> to vector<128x256xf32>
    %cst_10 = arith.constant dense<0.000000e+00> : vector<16x256xf32>
    %21 = tpu.matmul %1, %20, %cst_10 {dimension_numbers = #tpu.dot_dimension_numbers<[1], [0], [0], [1], [0, 0, 1, 1], [], []>} : vector<16x128xf32>, vector<128x256xf32>, vector<16x256xf32> -> vector<16x256xf32>
    %22 = arith.addf %18, %21 : vector<16x256xf32>
    %c2 = arith.constant 2 : index
    %c0_11 = arith.constant 0 : index
    %c0_12 = arith.constant 0 : index
    %23 = vector.load %arg2[%c2, %c0_11, %c0_12] : memref<3x128x256xf32, #tpu.memory_space<vmem>>, vector<1x128x256xf32>
    %24 = vector.shape_cast %23 : vector<1x128x256xf32> to vector<128x256xf32>
    %cst_13 = arith.constant dense<0.000000e+00> : vector<16x256xf32>
    %25 = tpu.matmul %15, %24, %cst_13 {dimension_numbers = #tpu.dot_dimension_numbers<[1], [0], [0], [1], [0, 0, 1, 1], [], []>} : vector<16x128xf32>, vector<128x256xf32>, vector<16x256xf32> -> vector<16x256xf32>
    %26 = arith.addf %22, %25 : vector<16x256xf32>
    %c0_14 = arith.constant 0 : index
    %c0_15 = arith.constant 0 : index
    %27 = vector.load %arg3[%c0_14, %c0_15] : memref<1x256xf32, #tpu.memory_space<vmem>>, vector<1x256xf32>
    %28 = vector.broadcast %27 : vector<1x256xf32> to vector<16x256xf32>
    %29 = arith.addf %26, %28 : vector<16x256xf32>
    %cst_16 = arith.constant 0.000000e+00 : f32
    %30 = vector.broadcast %cst_16 : f32 to vector<16x256xf32>
    %31 = arith.maximumf %29, %30 : vector<16x256xf32>
    %32 = vector.extract_strided_slice %31 {offsets = [0, 0], sizes = [16, 128], strides = [1, 1]} : vector<16x256xf32> to vector<16x128xf32>
    %33 = vector.extract_strided_slice %31 {offsets = [0, 128], sizes = [16, 128], strides = [1, 1]} : vector<16x256xf32> to vector<16x128xf32>
    %34 = arith.maximumf %32, %33 : vector<16x128xf32>
    %35 = vector.extract_strided_slice %34 {offsets = [0, 0], sizes = [1, 128], strides = [1, 1]} : vector<16x128xf32> to vector<1x128xf32>
    %36 = vector.extract_strided_slice %34 {offsets = [1, 0], sizes = [1, 128], strides = [1, 1]} : vector<16x128xf32> to vector<1x128xf32>
    %37 = arith.maximumf %35, %36 : vector<1x128xf32>
    %38 = vector.extract_strided_slice %34 {offsets = [2, 0], sizes = [1, 128], strides = [1, 1]} : vector<16x128xf32> to vector<1x128xf32>
    %39 = vector.extract_strided_slice %34 {offsets = [3, 0], sizes = [1, 128], strides = [1, 1]} : vector<16x128xf32> to vector<1x128xf32>
    %40 = arith.maximumf %38, %39 : vector<1x128xf32>
    %41 = vector.extract_strided_slice %34 {offsets = [4, 0], sizes = [1, 128], strides = [1, 1]} : vector<16x128xf32> to vector<1x128xf32>
    %42 = vector.extract_strided_slice %34 {offsets = [5, 0], sizes = [1, 128], strides = [1, 1]} : vector<16x128xf32> to vector<1x128xf32>
    %43 = arith.maximumf %41, %42 : vector<1x128xf32>
    %44 = vector.extract_strided_slice %34 {offsets = [6, 0], sizes = [1, 128], strides = [1, 1]} : vector<16x128xf32> to vector<1x128xf32>
    %45 = vector.extract_strided_slice %34 {offsets = [7, 0], sizes = [1, 128], strides = [1, 1]} : vector<16x128xf32> to vector<1x128xf32>
    %46 = arith.maximumf %44, %45 : vector<1x128xf32>
    %47 = vector.extract_strided_slice %34 {offsets = [8, 0], sizes = [1, 128], strides = [1, 1]} : vector<16x128xf32> to vector<1x128xf32>
    %48 = vector.extract_strided_slice %34 {offsets = [9, 0], sizes = [1, 128], strides = [1, 1]} : vector<16x128xf32> to vector<1x128xf32>
    %49 = arith.maximumf %47, %48 : vector<1x128xf32>
    %50 = vector.extract_strided_slice %34 {offsets = [10, 0], sizes = [1, 128], strides = [1, 1]} : vector<16x128xf32> to vector<1x128xf32>
    %51 = vector.extract_strided_slice %34 {offsets = [11, 0], sizes = [1, 128], strides = [1, 1]} : vector<16x128xf32> to vector<1x128xf32>
    %52 = arith.maximumf %50, %51 : vector<1x128xf32>
    %53 = vector.extract_strided_slice %34 {offsets = [12, 0], sizes = [1, 128], strides = [1, 1]} : vector<16x128xf32> to vector<1x128xf32>
    %54 = vector.extract_strided_slice %34 {offsets = [13, 0], sizes = [1, 128], strides = [1, 1]} : vector<16x128xf32> to vector<1x128xf32>
    %55 = arith.maximumf %53, %54 : vector<1x128xf32>
    %56 = vector.extract_strided_slice %34 {offsets = [14, 0], sizes = [1, 128], strides = [1, 1]} : vector<16x128xf32> to vector<1x128xf32>
    %57 = vector.extract_strided_slice %34 {offsets = [15, 0], sizes = [1, 128], strides = [1, 1]} : vector<16x128xf32> to vector<1x128xf32>
    %58 = arith.maximumf %56, %57 : vector<1x128xf32>
    %59 = tpu.concatenate %37, %40, %43, %46, %49, %52, %55, %58 in 1 : vector<1x128xf32>, vector<1x128xf32>, vector<1x128xf32>, vector<1x128xf32>, vector<1x128xf32>, vector<1x128xf32>, vector<1x128xf32>, vector<1x128xf32> -> vector<1x1024xf32>
    %c0_17 = arith.constant 0 : index
    %c0_18 = arith.constant 0 : index
    %60 = vector.load %arg4[%c0_17, %c0_18] : memref<1024x32xf32, #tpu.memory_space<vmem>>, vector<1024x32xf32>
    %cst_19 = arith.constant dense<0.000000e+00> : vector<1x32xf32>
    %61 = tpu.matmul %59, %60, %cst_19 {dimension_numbers = #tpu.dot_dimension_numbers<[1], [0], [0], [1], [0, 0, 1, 1], [], []>} : vector<1x1024xf32>, vector<1024x32xf32>, vector<1x32xf32> -> vector<1x32xf32>
    %c0_20 = arith.constant 0 : index
    %c0_21 = arith.constant 0 : index
    %62 = vector.load %arg5[%c0_20, %c0_21] : memref<1x32xf32, #tpu.memory_space<vmem>>, vector<1x32xf32>
    %63 = arith.addf %61, %62 : vector<1x32xf32>
    %cst_22 = arith.constant 0.000000e+00 : f32
    %64 = vector.broadcast %cst_22 : f32 to vector<1x32xf32>
    %65 = arith.maximumf %63, %64 : vector<1x32xf32>
    %c0_23 = arith.constant 0 : index
    %c0_24 = arith.constant 0 : index
    %66 = vector.load %arg6[%c0_23, %c0_24] : memref<32x10xf32, #tpu.memory_space<vmem>>, vector<32x10xf32>
    %cst_25 = arith.constant dense<0.000000e+00> : vector<1x10xf32>
    %67 = tpu.matmul %65, %66, %cst_25 {dimension_numbers = #tpu.dot_dimension_numbers<[1], [0], [0], [1], [0, 0, 1, 1], [], []>} : vector<1x32xf32>, vector<32x10xf32>, vector<1x10xf32> -> vector<1x10xf32>
    %c0_26 = arith.constant 0 : index
    %c0_27 = arith.constant 0 : index
    %68 = vector.load %arg7[%c0_26, %c0_27] : memref<1x10xf32, #tpu.memory_space<vmem>>, vector<1x10xf32>
    %69 = arith.addf %67, %68 : vector<1x10xf32>
    %70 = vector.shape_cast %69 : vector<1x10xf32> to vector<1x1x10xf32>
    %c0_28 = arith.constant 0 : index
    %c0_29 = arith.constant 0 : index
    %c0_30 = arith.constant 0 : index
    %71 = vector.load %arg8[%c0_28, %c0_29, %c0_30] : memref<1x1x10xf32, #tpu.memory_space<vmem>>, vector<1x1x10xf32>
    tpu.vector_store %arg8[%c0_28, %c0_29, %c0_30], %70 {strides = array<i32>} : memref<1x1x10xf32, #tpu.memory_space<vmem>>, vector<1x1x10xf32>,
    return
  }
  func.func @transform_0(%arg0: i32) -> (i32, i32, i32) {
    %c0_i32 = arith.constant 0 : i32
    %c0_i32_0 = arith.constant 0 : i32
    %c0_i32_1 = arith.constant 0 : i32
    return %arg0, %c0_i32, %c0_i32_0 : i32, i32, i32
  }
  func.func @transform_1(%arg0: i32) -> (i32, i32, i32) {
    %c0_i32 = arith.constant 0 : i32
    %c0_i32_0 = arith.constant 0 : i32
    %c0_i32_1 = arith.constant 0 : i32
    %c0_i32_2 = arith.constant 0 : i32
    return %c0_i32, %c0_i32_0, %c0_i32_1 : i32, i32, i32
  }
  func.func @transform_2(%arg0: i32) -> (i32, i32) {
    %c0_i32 = arith.constant 0 : i32
    %c0_i32_0 = arith.constant 0 : i32
    %c0_i32_1 = arith.constant 0 : i32
    return %c0_i32, %c0_i32_0 : i32, i32
  }
  func.func @transform_3(%arg0: i32) -> (i32, i32) {
    %c0_i32 = arith.constant 0 : i32
    %c0_i32_0 = arith.constant 0 : i32
    %c0_i32_1 = arith.constant 0 : i32
    return %c0_i32, %c0_i32_0 : i32, i32
  }
  func.func @transform_4(%arg0: i32) -> (i32, i32) {
    %c0_i32 = arith.constant 0 : i32
    %c0_i32_0 = arith.constant 0 : i32
    %c0_i32_1 = arith.constant 0 : i32
    return %c0_i32, %c0_i32_0 : i32, i32
  }
  func.func @transform_5(%arg0: i32) -> (i32, i32) {
    %c0_i32 = arith.constant 0 : i32
    %c0_i32_0 = arith.constant 0 : i32
    %c0_i32_1 = arith.constant 0 : i32
    return %c0_i32, %c0_i32_0 : i32, i32
  }
  func.func @transform_6(%arg0: i32) -> (i32, i32) {
    %c0_i32 = arith.constant 0 : i32
    %c0_i32_0 = arith.constant 0 : i32
    %c0_i32_1 = arith.constant 0 : i32
    return %c0_i32, %c0_i32_0 : i32, i32
  }
  func.func @transform_7(%arg0: i32) -> (i32, i32, i32) {
    %c0_i32 = arith.constant 0 : i32
    %c0_i32_0 = arith.constant 0 : i32
    %c0_i32_1 = arith.constant 0 : i32
    return %arg0, %c0_i32, %c0_i32_0 : i32, i32, i32
  }
}

</mosaic_0001>

<bundles_post_ra>
// kernel: vgg3_forward.1
= control target key start
LH: loop header
LB: loop body
LE: loop exit
PB: predicated region body
PF: predicated region fallthrough
CT: control target
= control target key end

     0   :  { %12 = vsyncpa [#allocation3], 0  ;;  %s2639_s0 = inlined_call_operand.vmem [shape: f32[2,16,128], index: 0, kind: input, shape index: {}]   ;;  %s2640_s1 = inlined_call_operand.vmem [shape: f32[3,128,256], index: 1, kind: input, shape index: {}]   ;;  %s2641_s2 = inlined_call_operand.vmem [shape: f32[1,256], index: 2, kind: input, shape index: {}]   ;;  %s2642_s3 = inlined_call_operand.vmem [shape: f32[1024,32], index: 3, kind: input, shape index: {}]   ;;  %s2643_s4 = inlined_call_operand.vmem [shape: f32[1,32], index: 4, kind: input, shape index: {}]   ;;  %s2644_s5 = inlined_call_operand.vmem [shape: f32[32,10], index: 5, kind: input, shape index: {}]   ;;  %s2645_s6 = inlined_call_operand.vmem [shape: f32[1,10], index: 6, kind: input, shape index: {}]   ;;  %s2646_s7 = inlined_call_operand.hbm [shape: f32[2,1,10], index: 7, kind: output, shape index: {}]  }
   0x1   :  { %14 = vsyncpa [#allocation3 + $0x1], 0  ;;  %s1807_s24 = smov 0   ;;  %s1809_s25 = smov 0  }
   0x2   :  { %s1811_s26 = smov 0   ;;  %s1813_s27 = smov 0  }
   0x3 LB: > { %s1828_s28 = sadd.s32 4294967295, %s1762_s27   ;;  %s1398_s29 = sadd.s32 4294967294, %s1762_s27   ;;  %s1762_s27 = sphi %s1813_s27, %s2652_s27   ;;  %s1758_s26 = sphi %s1811_s26, %s2651_s26   ;;  %s1754_s25 = sphi %s1809_s25, %s2650_s25   ;;  %s1750_s24 = sphi %s1807_s24, %s2649_s24  }
   0x4   : > { %s1832_s30 = sadd.s32 1, %s1762_s27   ;;  %s179_s8 = sadd.s32 1, %s1758_s26 }
   0x5   : > { %s176_s9 = ssub.s32 %s1762_s27, %s1832_s30  ;;  %p189_p0 = scmp.ne.s32.totalorder %s1758_s26, %s1754_s25 }
   0x6   : > { %p177_p1 = scmp.eq.s32.totalorder %s176_s9, 0  ;;  %p190_p2 = scmp.eq.s32.totalorder %s1828_s28, 1 }
   0x7   : > { %p195_p3 = scmp.ne.s32.totalorder %s1754_s25, %s1750_s24  ;;  %p196_p4 = scmp.eq.s32.totalorder %s1398_s29, 1 }
   0x8   : > { %s1843_s10 = scalar_select %p177_p1, %s1758_s26, %s179_s8  }
   0x9   : > { %p1845_p5 = por %p190_p2, %p189_p0  ;;  %p1849_p6 = por %p196_p4, %p195_p3 }
   0xa   : > { %p1401_p7 = scmp.ge.s32.totalorder %s1762_s27, 1  ;;  %p240_p8 = scmp.lt.s32.totalorder %s1762_s27, 3 }
   0xc   : > { %p241_p9 = pnand %p1401_p7, %p240_p8 }
   0xd   : > { %p271_p10 = scmp.lt.s32.totalorder (!%p241_p9), %s1828_s28, 1  ;;  %s269_s16 = sand.u32 (!%p241_p9), 1, %s1754_s25  }
   0xe   : > { %244 = sbr.rel (%p241_p9) target bundleno = 882 (0x372), region = 48  ;;  %s1479_s19 = sshll.u32 (!%p241_p9), %s1828_s28, 4 }
   0xf   : > { %s270_s20 = scalar_lea.vmem (!%p241_p9), [#allocation2], %s269_s16  ;;  %s2604_s29 = scalar_lea.hbm (!%p241_p9), %s2646_s7, %s1479_s19 }
  0x10   : > { %s1331_s8 = scalar_lea.sflag (!%p241_p9), [#allocation3], %s269_s16 }
  0x13   : > { %v278_v0 = vlaneseq  ;;  %v1445_v1 = vld [vmem:[%s2640_s1 + $0x1f8] sm:$0xff]  ;;  %v1444_v2 = vld [vmem:[%s2640_s1 + $0x1f0] sm:$0xff]  ;;  %v1443_v3 = vld [vmem:[%s2640_s1 + $0x1e8] sm:$0xff]  ;;  %v1764_v5 = vmov 0.0   ;;  %s272_s21 = scalar_select %p271_p10, %s1828_s28, 1  ;;  %vm299_vm0 = vcmask 130048  }
  0x14   : > { %527 = vmatprep.subr.mxu0 %v1445_v1  ;;  %v1442_v4 = vld [vmem:[%s2640_s1 + $0x1e0] sm:$0xff]  ;;  %591 = vmatprep.mubr.f32.mxu0 %v1764_v5  ;;  %v1441_v8 = vld [vmem:[%s2640_s1 + $0x1d8] sm:$0xff]  ;;  %v1440_v9 = vld [vmem:[%s2640_s1 + $0x1d0] sm:$0xff]  ;;  %vm1765_vm5 = vmmov 0   ;;  %vm1254_vm6 = vcmask 261120   ;;  %vm1328_vm7 = vcmask 73728  }
  0x15   : > { %v1870_v6 = vshrl.u32 %v278_v0, 7  ;;  %v282_v7 = vand.u32 127, %v278_v0  ;;  %528 = vmatpush1.msra.mxu0 %v1444_v2  ;;  %s1482_s9 = sshll.u32 %s272_s21, 4  ;;  %v1439_v13 = vld [vmem:[%s2640_s1 + $0x1c8] sm:$0xff]  ;;  %v1438_v18 = vld [vmem:[%s2640_s1 + $0x1c0] sm:$0xff]  ;;  %v1437_v20 = vld [vmem:[%s2640_s1 + $0x1b8] sm:$0xff] }
  0x16   : > { %529 = vmatprep.subr.mxu0 %v1443_v3  ;;  %s275_s17 = scalar_lea.vmem %s2639_s0, %s1482_s9  ;;  %v1436_v23 = vld [vmem:[%s2640_s1 + $0x1b0] sm:$0xff]  ;;  %v1435_v24 = vld [vmem:[%s2640_s1 + $0x1a8] sm:$0xff]  ;;  %v1434_v26 = vld [vmem:[%s2640_s1 + $0x1a0] sm:$0xff]  ;;  %s1343_s21 = sshll.u32 %s270_s20, 4  ;;  %s1344_s21 = int_to_ptr.vmem [resolvable:$true] %s1343_s21 }
  0x17   : > { %v1404_v10 = vadd.s32 4294967295, %v1870_v6  ;;  %v280_v11 = vadd.s32 8, %v1870_v6  ;;  %v291_v12 = vadd.s32 1, %v1870_v6  ;;  %530 = vmatpush1.msra.mxu0 %v1442_v4  ;;  %v1887_v14 = vld [vmem:[%s275_s17 + $0x8] sm:$0xff]  ;;  %v1889_v15 = vld [vmem:[%s275_s17] sm:$0xff]  ;;  %v1433_v27 = vld [vmem:[%s2640_s1 + $0x198] sm:$0xff] }
  0x18   : > { %531 = vmatprep.subr.mxu0 %v1441_v8  ;;  %1636 = vmatprep.subr.mxu1 %v1887_v14  ;;  %v493_v28 = vld [vmem:[%s2640_s1 + $0xf8] sm:$0xff]  ;;  %v1432_v29 = vld [vmem:[%s2640_s1 + $0x190] sm:$0xff]  ;;  %v1431_v31 = vld [vmem:[%s2640_s1 + $0x188] sm:$0xff]  ;;  %s1702_s9 = scalar_lea.vmem %s1344_s21, 16  ;;  %s1766_s28 = smov [#allocation2]  }
  0x19   : > { %vm285_vm1 = vcmp.eq.s32.totalorder %v282_v7, %v1404_v10  ;;  %v1405_v16 = vadd.s32 4294967295, %v280_v11  ;;  %vm293_vm2 = vcmp.eq.s32.totalorder %v282_v7, %v291_v12  ;;  %v292_v17 = vadd.s32 1, %v280_v11  ;;  %532 = vmatpush1.msra.mxu0 %v1440_v9  ;;  %1637 = vmatpush3.msra.mxu1 %v1887_v14  ;;  %v492_v30 = vld [vmem:[%s2640_s1 + $0xf0] sm:$0xff]  ;;  %v491_v32 = vld [vmem:[%s2640_s1 + $0xe8] sm:$0xff]  ;;  %v1430_v33 = vld [vmem:[%s2640_s1 + $0x180] sm:$0xff]  ;;  %p1703_p11 = scmp.ne.s32.totalorder %s1344_s21, %s1702_s9  ;;  %s1706_s13 = sshll.u32 %s1766_s28, 4  ;;  %s1707_s13 = int_to_ptr.vmem [resolvable:$false] %s1706_s13 }
  0x1a   : > { %v1406_v19 = vsel %vm285_vm1, 1.0, %v1764_v5  ;;  %533 = vmatprep.subr.mxu0 %v1439_v13  ;;  %1638 = vmatprep.subr.mxu1 %v1889_v15  ;;  %v1408_v22 = vsel %vm293_vm2, 1.0, %v1764_v5  ;;  %v490_v34 = vld [vmem:[%s2640_s1 + $0xe0] sm:$0xff]  ;;  %v1429_v35 = vld [vmem:[%s2640_s1 + $0x178] sm:$0xff]  ;;  %v1428_v37 = vld [vmem:[%s2640_s1 + $0x170] sm:$0xff]  ;;  %s1708_s14 = scalar_lea.vmem %s1707_s13, 32  ;;  %p1709_p0 = scmp.lt.s32.totalorder %s1344_s21, %s1707_s13 }
  0x1b   : > { %1640 = vmatprep.mubr.msk.f32.mxu1 %vm299_vm0, %v1406_v19  ;;  %vm286_vm3 = vcmp.eq.s32.totalorder %v282_v7, %v1405_v16  ;;  %vm294_vm4 = vcmp.eq.s32.totalorder %v282_v7, %v292_v17  ;;  %534 = vmatpush1.msra.mxu0 %v1438_v18  ;;  %v489_v36 = vld [vmem:[%s2640_s1 + $0xd8] sm:$0xff]  ;;  %v488_v38 = vld [vmem:[%s2640_s1 + $0xd0] sm:$0xff]  ;;  %v1427_v39 = vld [vmem:[%s2640_s1 + $0x168] sm:$0xff]  ;;  %p1704_p12 = pnand %p1703_p11, %p1845_p5  ;;  %p1710_p1 = scmp.lt.s32.totalorder %s1708_s14, %s1702_s9 }
  0x1c   : > { %v1407_v21 = vsel %vm286_vm3, 1.0, %v1764_v5  ;;  %1639 = vmatpush3.msra.mxu1 %v1889_v15  ;;  %535 = vmatprep.subr.mxu0 %v1437_v20  ;;  %v1409_v25 = vsel %vm294_vm4, 1.0, %v1764_v5  ;;  %v487_v40 = vld [vmem:[%s2640_s1 + $0xc8] sm:$0xff]  ;;  %v1426_v41 = vld [vmem:[%s2640_s1 + $0x160] sm:$0xff]  ;;  %v1425_v43 = vld [vmem:[%s2640_s1 + $0x158] sm:$0xff] }
  0x1d   : > { %1641 = vmatmul.mubr.msk.f32.vlgmr.msra.gmra.mxu1 %vm299_vm0, %v1407_v21  ;;  %1643 = vmatprep.subr.mxu1 %v1887_v14  ;;  %v486_v42 = vld [vmem:[%s2640_s1 + $0xc0] sm:$0xff]  ;;  %v485_v44 = vld [vmem:[%s2640_s1 + $0xb8] sm:$0xff]  ;;  %v1424_v45 = vld [vmem:[%s2640_s1 + $0x150] sm:$0xff]  ;;  %p1705_p13 = pneg %p1704_p12  ;;  %p1711_p2 = por %p1710_p1, %p1709_p0 }
  0x1e   : > { %1644 = vmatpush3.msra.mxu1 %v1887_v14  ;;  %1647 = vmatprep.mubr.msk.f32.mxu1 %vm299_vm0, %v1408_v22  ;;  %v484_v46 = vld [vmem:[%s2640_s1 + $0xb0] sm:$0xff]  ;;  %v1423_v47 = vld [vmem:[%s2640_s1 + $0x148] sm:$0xff]  ;;  %v1422_v49 = vld [vmem:[%s2640_s1 + $0x140] sm:$0xff] }
  0x1f   : > { %1645 = vmatprep.subr.mxu1 %v1889_v15  ;;  %536 = vmatpush1.msra.mxu0 %v1436_v23  ;;  %v483_v48 = vld [vmem:[%s2640_s1 + $0xa8] sm:$0xff]  ;;  %v482_v50 = vld [vmem:[%s2640_s1 + $0xa0] sm:$0xff]  ;;  %v1421_v51 = vld [vmem:[%s2640_s1 + $0x138] sm:$0xff]  ;;  %p1712_p3 = pnand %p1711_p2, %p1705_p13 }
  0x20   : > { %1646 = vmatpush3.msra.mxu1 %v1889_v15  ;;  %537 = vmatprep.subr.mxu0 %v1435_v24  ;;  %v481_v52 = vld [vmem:[%s2640_s1 + $0x98] sm:$0xff]  ;;  %v1420_v53 = vld [vmem:[%s2640_s1 + $0x130] sm:$0xff]  ;;  %v1419_v55 = vld [vmem:[%s2640_s1 + $0x128] sm:$0xff] }
  0x21   : > { %1648 = vmatmul.mubr.msk.f32.vlgmr.msra.gmra.mxu1 %vm299_vm0, %v1409_v25  ;;  %538 = vmatpush1.msra.mxu0 %v1434_v26  ;;  %v480_v54 = vld [vmem:[%s2640_s1 + $0x90] sm:$0xff]  ;;  %v479_v56 = vld [vmem:[%s2640_s1 + $0x88] sm:$0xff]  ;;  %v1418_v57 = vld [vmem:[%s2640_s1 + $0x120] sm:$0xff] }
  0x22   : > { %539 = vmatprep.subr.mxu0 %v1433_v27  ;;  %604 = vmatprep.subr.mxu1 %v493_v28  ;;  %v478_v58 = vld [vmem:[%s2640_s1 + $0x80] sm:$0xff]  ;;  %v1417_v59 = vld [vmem:[%s2640_s1 + $0x118] sm:$0xff]  ;;  %v1416_v61 = vld [vmem:[%s2640_s1 + $0x110] sm:$0xff] }
  0x23   : > { %540 = vmatpush1.msra.mxu0 %v1432_v29  ;;  %605 = vmatpush1.msra.mxu1 %v492_v30  ;;  %v477_v60 = vld [vmem:[%s2640_s1 + $0x78] sm:$0xff]  ;;  %v476_v62 = vld [vmem:[%s2640_s1 + $0x70] sm:$0xff]  ;;  %v1415_v63 = vld [vmem:[%s2640_s1 + $0x108] sm:$0xff] }
  0x24   : > { %541 = vmatprep.subr.mxu0 %v1431_v31  ;;  %606 = vmatprep.subr.mxu1 %v491_v32  ;;  %v475_v0 = vld [vmem:[%s2640_s1 + $0x68] sm:$0xff]  ;;  %v1414_v1 = vld [vmem:[%s2640_s1 + $0x100] sm:$0xff]  ;;  %v1477_v3 = vld [vmem:[%s2640_s1 + $0x2f8] sm:$0xff] }
  0x25   : > { %542 = vmatpush1.msra.mxu0 %v1430_v33  ;;  %607 = vmatpush1.msra.mxu1 %v490_v34  ;;  %v474_v2 = vld [vmem:[%s2640_s1 + $0x60] sm:$0xff]  ;;  %v1476_v4 = vld [vmem:[%s2640_s1 + $0x2f0] sm:$0xff]  ;;  %v473_v7 = vld [vmem:[%s2640_s1 + $0x58] sm:$0xff] }
  0x26   : > { %543 = vmatprep.subr.mxu0 %v1429_v35  ;;  %608 = vmatprep.subr.mxu1 %v489_v36  ;;  %v1475_v8 = vld [vmem:[%s2640_s1 + $0x2e8] sm:$0xff]  ;;  %v472_v9 = vld [vmem:[%s2640_s1 + $0x50] sm:$0xff]  ;;  %v1474_v10 = vld [vmem:[%s2640_s1 + $0x2e0] sm:$0xff] }
  0x27   : > { %544 = vmatpush1.msra.mxu0 %v1428_v37  ;;  %609 = vmatpush1.msra.mxu1 %v488_v38  ;;  %v471_v11 = vld [vmem:[%s2640_s1 + $0x48] sm:$0xff]  ;;  %v1473_v12 = vld [vmem:[%s2640_s1 + $0x2d8] sm:$0xff]  ;;  %v470_v13 = vld [vmem:[%s2640_s1 + $0x40] sm:$0xff] }
  0x28   : > { %545 = vmatprep.subr.mxu0 %v1427_v39  ;;  %610 = vmatprep.subr.mxu1 %v487_v40  ;;  %v469_v16 = vld [vmem:[%s2640_s1 + $0x38] sm:$0xff]  ;;  %v1471_v17 = vld [vmem:[%s2640_s1 + $0x2c8] sm:$0xff]  ;;  %v468_v18 = vld [vmem:[%s2640_s1 + $0x30] sm:$0xff] }
  0x29   : > { %546 = vmatpush1.msra.mxu0 %v1426_v41  ;;  %611 = vmatpush1.msra.mxu1 %v486_v42  ;;  %v1470_v19 = vld [vmem:[%s2640_s1 + $0x2c0] sm:$0xff]  ;;  %v467_v20 = vld [vmem:[%s2640_s1 + $0x28] sm:$0xff]  ;;  %v1469_v21 = vld [vmem:[%s2640_s1 + $0x2b8] sm:$0xff] }
  0x2a   : > { %547 = vmatprep.subr.mxu0 %v1425_v43  ;;  %612 = vmatprep.subr.mxu1 %v485_v44  ;;  %v466_v22 = vld [vmem:[%s2640_s1 + $0x20] sm:$0xff]  ;;  %v1468_v23 = vld [vmem:[%s2640_s1 + $0x2b0] sm:$0xff]  ;;  %v465_v24 = vld [vmem:[%s2640_s1 + $0x18] sm:$0xff] }
  0x2b   : > { %548 = vmatpush1.msra.mxu0 %v1424_v45  ;;  %613 = vmatpush1.msra.mxu1 %v484_v46  ;;  %v1467_v25 = vld [vmem:[%s2640_s1 + $0x2a8] sm:$0xff]  ;;  %v1466_v26 = vld [vmem:[%s2640_s1 + $0x2a0] sm:$0xff]  ;;  %v1465_v27 = vld [vmem:[%s2640_s1 + $0x298] sm:$0xff] }
  0x2c   : > { %549 = vmatprep.subr.mxu0 %v1423_v47  ;;  %614 = vmatprep.subr.mxu1 %v483_v48  ;;  %v1464_v28 = vld [vmem:[%s2640_s1 + $0x290] sm:$0xff]  ;;  %v1463_v29 = vld [vmem:[%s2640_s1 + $0x288] sm:$0xff]  ;;  %v1462_v30 = vld [vmem:[%s2640_s1 + $0x280] sm:$0xff] }
  0x2d   : > { %550 = vmatpush1.msra.mxu0 %v1422_v49  ;;  %615 = vmatpush1.msra.mxu1 %v482_v50  ;;  %v1461_v31 = vld [vmem:[%s2640_s1 + $0x278] sm:$0xff]  ;;  %v1460_v32 = vld [vmem:[%s2640_s1 + $0x270] sm:$0xff]  ;;  %v1459_v33 = vld [vmem:[%s2640_s1 + $0x268] sm:$0xff] }
  0x2e   : > { %551 = vmatprep.subr.mxu0 %v1421_v51  ;;  %616 = vmatprep.subr.mxu1 %v481_v52  ;;  %v1457_v34 = vld [vmem:[%s2640_s1 + $0x258] sm:$0xff]  ;;  %v1456_v35 = vld [vmem:[%s2640_s1 + $0x250] sm:$0xff]  ;;  %v1455_v36 = vld [vmem:[%s2640_s1 + $0x248] sm:$0xff] }
  0x2f   : > { %552 = vmatpush1.msra.mxu0 %v1420_v53  ;;  %617 = vmatpush1.msra.mxu1 %v480_v54  ;;  %v1454_v37 = vld [vmem:[%s2640_s1 + $0x240] sm:$0xff]  ;;  %v1453_v38 = vld [vmem:[%s2640_s1 + $0x238] sm:$0xff]  ;;  %v464_v39 = vld [vmem:[%s2640_s1 + $0x10] sm:$0xff] }
  0x30   : > { %553 = vmatprep.subr.mxu0 %v1419_v55  ;;  %618 = vmatprep.subr.mxu1 %v479_v56  ;;  %v1452_v40 = vld [vmem:[%s2640_s1 + $0x230] sm:$0xff]  ;;  %v463_v41 = vld [vmem:[%s2640_s1 + $0x8] sm:$0xff]  ;;  %v462_v43 = vld [vmem:[%s2640_s1] sm:$0xff] }
  0x31   : > { %554 = vmatpush1.msra.mxu0 %v1418_v57  ;;  %619 = vmatpush1.msra.mxu1 %v478_v58  ;;  %v1451_v42 = vld [vmem:[%s2640_s1 + $0x228] sm:$0xff]  ;;  %v1450_v44 = vld [vmem:[%s2640_s1 + $0x220] sm:$0xff]  ;;  %v1449_v45 = vld [vmem:[%s2640_s1 + $0x218] sm:$0xff] }
  0x32   : > { %555 = vmatprep.subr.mxu0 %v1417_v59  ;;  %620 = vmatprep.subr.mxu1 %v477_v60  ;;  %v1448_v46 = vld [vmem:[%s2640_s1 + $0x210] sm:$0xff]  ;;  %v1447_v47 = vld [vmem:[%s2640_s1 + $0x208] sm:$0xff]  ;;  %v1446_v48 = vld [vmem:[%s2640_s1 + $0x200] sm:$0xff] }
  0x33   : > { %556 = vmatpush1.msra.mxu0 %v1416_v61  ;;  %621 = vmatpush1.msra.mxu1 %v476_v62  ;;  %v870_v49 = vld [vmem:[%s2642_s3 + $0xf8] sm:$0xff]  ;;  %v869_v54 = vld [vmem:[%s2642_s3 + $0xf0] sm:$0xff]  ;;  %v868_v60 = vld [vmem:[%s2642_s3 + $0xe8] sm:$0xff] }
  0x34   : > { %557 = vmatprep.subr.mxu0 %v1415_v63  ;;  %622 = vmatprep.subr.mxu1 %v475_v0  ;;  %v902_v50 = vld [vmem:[%s2642_s3 + $0x1f8] sm:$0xff]  ;;  %v853_v55 = vld [vmem:[%s2642_s3 + $0x70] sm:$0xff]  ;;  %v852_v62 = vld [vmem:[%s2642_s3 + $0x68] sm:$0xff] }
  0x35   : > { %558 = vmatpush1.msra.mxu0 %v1414_v1  ;;  %623 = vmatpush1.msra.mxu1 %v474_v2  ;;  %v854_v52 = vld [vmem:[%s2642_s3 + $0x78] sm:$0xff]  ;;  %v901_v59 = vld [vmem:[%s2642_s3 + $0x1f0] sm:$0xff]  ;;  %v900_v63 = vld [vmem:[%s2642_s3 + $0x1e8] sm:$0xff] }
  0x36   : > { %592 = vmatmul.mubr.f32.vlgmr.msra.gmra.mxu0 %v1889_v15  ;;  %714 = vmatprep.subr.mxu0 %v1477_v3  ;;  %v1472_v15 = vld [vmem:[%s2640_s1 + $0x2d0] sm:$0xff]  ;;  %v886_v57 = vld [vmem:[%s2642_s3 + $0x178] sm:$0xff]  ;;  %v884_v0 = vld [vmem:[%s2642_s3 + $0x168] sm:$0xff] }
  0x37   : > { %715 = vmatpush1.msra.mxu0 %v1476_v4  ;;  %624 = vmatprep.subr.mxu1 %v473_v7  ;;  %v885_v61 = vld [vmem:[%s2642_s3 + $0x170] sm:$0xff]  ;;  %v867_v1 = vld [vmem:[%s2642_s3 + $0xe0] sm:$0xff]  ;;  %v866_v7 = vld [vmem:[%s2642_s3 + $0xd8] sm:$0xff] }
  0x38   : > { %716 = vmatprep.subr.mxu0 %v1475_v8  ;;  %625 = vmatpush1.msra.mxu1 %v472_v9  ;;  %v899_v2 = vld [vmem:[%s2642_s3 + $0x1e0] sm:$0xff]  ;;  %v898_v8 = vld [vmem:[%s2642_s3 + $0x1d8] sm:$0xff] }
  0x39   : > { %717 = vmatpush1.msra.mxu0 %v1474_v10  ;;  %626 = vmatprep.subr.mxu1 %v471_v11  ;;  %v851_v3 = vld [vmem:[%s2642_s3 + $0x60] sm:$0xff]  ;;  %v850_v9 = vld [vmem:[%s2642_s3 + $0x58] sm:$0xff]  ;;  %v865_v11 = vld [vmem:[%s2642_s3 + $0xd0] sm:$0xff] }
  0x3a   : > { %718 = vmatprep.subr.mxu0 %v1473_v12  ;;  %627 = vmatpush1.msra.mxu1 %v470_v13  ;;  %v883_v4 = vld [vmem:[%s2642_s3 + $0x160] sm:$0xff]  ;;  %v882_v10 = vld [vmem:[%s2642_s3 + $0x158] sm:$0xff]  ;;  %v897_v12 = vld [vmem:[%s2642_s3 + $0x1d0] sm:$0xff] }
  0x3b   : > { %719 = vmatpush1.msra.mxu0 %v1472_v15  ;;  %628 = vmatprep.subr.mxu1 %v469_v16  ;;  %v849_v13 = vld [vmem:[%s2642_s3 + $0x50] sm:$0xff]  ;;  %v864_v16 = vld [vmem:[%s2642_s3 + $0xc8] sm:$0xff] }
  0x3c   : > { %720 = vmatprep.subr.mxu0 %v1471_v17  ;;  %629 = vmatpush1.msra.mxu1 %v468_v18  ;;  %v881_v15 = vld [vmem:[%s2642_s3 + $0x150] sm:$0xff]  ;;  %v896_v17 = vld [vmem:[%s2642_s3 + $0x1c8] sm:$0xff] }
  0x3d   : > { %721 = vmatpush1.msra.mxu0 %v1470_v19  ;;  %630 = vmatprep.subr.mxu1 %v467_v20  ;;  %v848_v18 = vld [vmem:[%s2642_s3 + $0x48] sm:$0xff]  ;;  %v863_v20 = vld [vmem:[%s2642_s3 + $0xc0] sm:$0xff] }
  0x3e   : > { %722 = vmatprep.subr.mxu0 %v1469_v21  ;;  %631 = vmatpush1.msra.mxu1 %v466_v22  ;;  %v880_v19 = vld [vmem:[%s2642_s3 + $0x148] sm:$0xff]  ;;  %v895_v21 = vld [vmem:[%s2642_s3 + $0x1c0] sm:$0xff] }
  0x3f   : > { %723 = vmatpush1.msra.mxu0 %v1468_v23  ;;  %632 = vmatprep.subr.mxu1 %v465_v24  ;;  %v847_v22 = vld [vmem:[%s2642_s3 + $0x40] sm:$0xff]  ;;  %v862_v24 = vld [vmem:[%s2642_s3 + $0xb8] sm:$0xff] }
  0x40   : > { %724 = vmatprep.subr.mxu0 %v1467_v25  ;;  %597 = vmatprep.mubr.f32.mxu0 %v1764_v5  ;;  %v879_v23 = vld [vmem:[%s2642_s3 + $0x140] sm:$0xff]  ;;  %v894_v25 = vld [vmem:[%s2642_s3 + $0x1b8] sm:$0xff] }
  0x41   : > { %725 = vmatpush1.msra.mxu0 %v1466_v26  ;;  %668 = vmatprep.mubr.f32.mxu1 %v1764_v5  ;;  %v846_v26 = vld [vmem:[%s2642_s3 + $0x38] sm:$0xff] }
  0x42   : > { %726 = vmatprep.subr.mxu0 %v1465_v27  ;;  %598 = vmatmul.mubr.f32.gmra.mxu0 %v1887_v14  ;;  %v1458_v14 = vld [vmem:[%s2640_s1 + $0x260] sm:$0xff]  ;;  %v878_v27 = vld [vmem:[%s2642_s3 + $0x138] sm:$0xff] }
  0x43   : > { %727 = vmatpush1.msra.mxu0 %v1464_v28  ;;  %778 = vmatprep.mubr.f32.mxu0 %v1764_v5  ;;  %v861_v28 = vld [vmem:[%s2642_s3 + $0xb0] sm:$0xff] }
  0x44   : > { %728 = vmatprep.subr.mxu0 %v1463_v29  ;;  %633 = vmatpush1.msra.mxu1 %v464_v39  ;;  %v893_v29 = vld [vmem:[%s2642_s3 + $0x1b0] sm:$0xff]  ;;  %v858_v39 = vld [vmem:[%s2642_s3 + $0x98] sm:$0xff] }
  0x45   : > { %729 = vmatpush1.msra.mxu0 %v1462_v30  ;;  %634 = vmatprep.subr.mxu1 %v463_v41  ;;  %v845_v30 = vld [vmem:[%s2642_s3 + $0x30] sm:$0xff]  ;;  %v842_v41 = vld [vmem:[%s2642_s3 + $0x18] sm:$0xff] }
  0x46   : > { %730 = vmatprep.subr.mxu0 %v1461_v31  ;;  %635 = vmatpush1.msra.mxu1 %v462_v43  ;;  %v877_v31 = vld [vmem:[%s2642_s3 + $0x130] sm:$0xff] }
  0x47   : > { %731 = vmatpush1.msra.mxu0 %v1460_v32  ;;  %1491 = vmatprep.subr.mxu1 %v870_v49  ;;  %v860_v32 = vld [vmem:[%s2642_s3 + $0xa8] sm:$0xff]  ;;  %v857_v43 = vld [vmem:[%s2642_s3 + $0x90] sm:$0xff] }
  0x48   : > { %732 = vmatprep.subr.mxu0 %v1459_v33  ;;  %v892_v33 = vld [vmem:[%s2642_s3 + $0x1a8] sm:$0xff] }
  0x49   : > { %733 = vmatpush1.msra.mxu0 %v1458_v14  ;;  %v844_v14 = vld [vmem:[%s2642_s3 + $0x28] sm:$0xff] }
  0x4a   : > { %734 = vmatprep.subr.mxu0 %v1457_v34  ;;  %v876_v34 = vld [vmem:[%s2642_s3 + $0x128] sm:$0xff] }
  0x4b   : > { %735 = vmatpush1.msra.mxu0 %v1456_v35  ;;  %v859_v35 = vld [vmem:[%s2642_s3 + $0xa0] sm:$0xff]  ;;  %v840_v49 = vld [vmem:[%s2642_s3 + $0x8] sm:$0xff] }
  0x4c   : > { %736 = vmatprep.subr.mxu0 %v1455_v36  ;;  %v891_v36 = vld [vmem:[%s2642_s3 + $0x1a0] sm:$0xff] }
  0x4d   : > { %737 = vmatpush1.msra.mxu0 %v1454_v37  ;;  %v843_v37 = vld [vmem:[%s2642_s3 + $0x20] sm:$0xff] }
  0x4e   : > { %738 = vmatprep.subr.mxu0 %v1453_v38  ;;  %v875_v38 = vld [vmem:[%s2642_s3 + $0x120] sm:$0xff] }
  0x4f   : > { %739 = vmatpush1.msra.mxu0 %v1452_v40  ;;  %v890_v40 = vld [vmem:[%s2642_s3 + $0x198] sm:$0xff] }
  0x50   : > { %740 = vmatprep.subr.mxu0 %v1451_v42  ;;  %v874_v42 = vld [vmem:[%s2642_s3 + $0x118] sm:$0xff] }
  0x51   : > { %741 = vmatpush1.msra.mxu0 %v1450_v44  ;;  %v889_v44 = vld [vmem:[%s2642_s3 + $0x190] sm:$0xff] }
  0x52   : > { %742 = vmatprep.subr.mxu0 %v1449_v45  ;;  %v841_v45 = vld [vmem:[%s2642_s3 + $0x10] sm:$0xff] }
  0x53   : > { %743 = vmatpush1.msra.mxu0 %v1448_v46  ;;  %v873_v46 = vld [vmem:[%s2642_s3 + $0x110] sm:$0xff] }
  0x54   : > { %744 = vmatprep.subr.mxu0 %v1447_v47  ;;  %v856_v47 = vld [vmem:[%s2642_s3 + $0x88] sm:$0xff] }
  0x55   : > { %745 = vmatpush1.msra.mxu0 %v1446_v48  ;;  %v888_v48 = vld [vmem:[%s2642_s3 + $0x188] sm:$0xff] }
  0x56   : > { %1526 = vmatprep.subr.mxu0 %v902_v50  ;;  %v872_v50 = vld [vmem:[%s2642_s3 + $0x108] sm:$0xff] }
  0xdd   : > { %v1642_v51 = vpop.f32.mrf.mxu1 }
  0xdf   : > { %v372_v53 = vpop.f32.mrf.mxu1 }
  0xe0   : > { %669 = vmatmul.mubr.f32.vlgmr.msra.gmra.mxu1 %v372_v53  ;;  %v839_v53 = vld [vmem:[%s2642_s3] sm:$0xff] }
  0xe1   : > { %v1649_v56 = vpop.f32.mrf.mxu1  ;;  %674 = vmatprep.mubr.f32.mxu1 %v1764_v5  ;;  %1492 = vmatpush3.msra.mxu1 %v854_v52  ;;  %v887_v52 = vld [vmem:[%s2642_s3 + $0x180] sm:$0xff] }
  0xe2   : > { %1493 = vmatprep.subr.mxu1 %v869_v54  ;;  %v871_v54 = vld [vmem:[%s2642_s3 + $0x100] sm:$0xff] }
  0xe3   : > { %v453_v58 = vpop.f32.mrf.mxu1  ;;  %1494 = vmatpush3.msra.mxu1 %v853_v55  ;;  %v934_v55 = vld [vmem:[%s2642_s3 + $0x2f8] sm:$0xff] }
  0xe4   : > { %675 = vmatmul.mubr.f32.gmra.mxu1 %v1642_v51  ;;  %779 = vmatmul.mubr.f32.vlgmr.msra.gmra.mxu0 %v453_v58  ;;  %v855_v51 = vld [vmem:[%s2642_s3 + $0x80] sm:$0xff] }
  0xe5   : > { %784 = vmatprep.mubr.f32.mxu0 %v1764_v5  ;;  %1527 = vmatpush3.msra.mxu0 %v886_v57 }
  0xe6   : > { %1528 = vmatprep.subr.mxu0 %v901_v59  ;;  %1495 = vmatprep.subr.mxu1 %v868_v60  ;;  %v799_v60 = vsub.s32 0, %v1870_v6 }
  0xe7   : > { %1529 = vmatpush3.msra.mxu0 %v885_v61  ;;  %1496 = vmatpush3.msra.mxu1 %v852_v62  ;;  %v795_v62 = vld [vmem:[%s2641_s2] sm:$0x3] }
  0xe8   : > { %785 = vmatmul.mubr.f32.gmra.mxu0 %v1649_v56  ;;  %1530 = vmatprep.subr.mxu0 %v900_v63  ;;  %v966_v56 = vld [vmem:[%s2642_s3 + $0x3f8] sm:$0xff]  ;;  %v803_v63 = vsub.s32 1, %v1870_v6 }
  0xe9   : > { %1531 = vmatpush3.msra.mxu0 %v884_v0  ;;  %1497 = vmatprep.subr.mxu1 %v867_v1 }
  0xea   : > { %1532 = vmatprep.subr.mxu0 %v899_v2  ;;  %1498 = vmatpush3.msra.mxu1 %v851_v3  ;;  %v800_v3 = vrot.slane %v795_v62, %v799_v60  ;;  %v928_v60 = vld [vmem:[%s2642_s3 + $0x2c8] sm:$0xff] }
  0xeb   : > { %1533 = vmatpush3.msra.mxu0 %v883_v4  ;;  %1499 = vmatprep.subr.mxu1 %v866_v7 }
  0xec   : > { %1534 = vmatprep.subr.mxu0 %v898_v8  ;;  %1500 = vmatpush3.msra.mxu1 %v850_v9 }
  0xed   : > { %1535 = vmatpush3.msra.mxu0 %v882_v10  ;;  %1501 = vmatprep.subr.mxu1 %v865_v11  ;;  %v804_v10 = vrot.slane %v795_v62, %v803_v63  ;;  %v912_v62 = vld [vmem:[%s2642_s3 + $0x248] sm:$0xff] }
  0xee   : > { %1536 = vmatprep.subr.mxu0 %v897_v12  ;;  %1502 = vmatpush3.msra.mxu1 %v849_v13  ;;  %v944_v63 = vld [vmem:[%s2642_s3 + $0x348] sm:$0xff] }
  0xef   : > { %1537 = vmatpush3.msra.mxu0 %v881_v15  ;;  %1503 = vmatprep.subr.mxu1 %v864_v16 }
  0xf0   : > { %1538 = vmatprep.subr.mxu0 %v896_v17  ;;  %1504 = vmatpush3.msra.mxu1 %v848_v18 }
  0xf1   : > { %1539 = vmatpush3.msra.mxu0 %v880_v19  ;;  %1505 = vmatprep.subr.mxu1 %v863_v20 }
  0xf2   : > { %1540 = vmatprep.subr.mxu0 %v895_v21  ;;  %1506 = vmatpush3.msra.mxu1 %v847_v22 }
  0xf3   : > { %1541 = vmatpush3.msra.mxu0 %v879_v23  ;;  %1507 = vmatprep.subr.mxu1 %v862_v24 }
  0xf4   : > { %1542 = vmatprep.subr.mxu0 %v894_v25  ;;  %1508 = vmatpush3.msra.mxu1 %v846_v26 }
  0xf5   : > { %1543 = vmatpush3.msra.mxu0 %v878_v27  ;;  %1509 = vmatprep.subr.mxu1 %v861_v28 }
  0xf6   : > { %1544 = vmatprep.subr.mxu0 %v893_v29  ;;  %1510 = vmatpush3.msra.mxu1 %v845_v30  ;;  %v593_v57 = vpop.f32.mrf.mxu0 }
  0xf7   : > { %1545 = vmatpush3.msra.mxu0 %v877_v31  ;;  %1511 = vmatprep.subr.mxu1 %v860_v32 }
  0xf8   : > { %1546 = vmatprep.subr.mxu0 %v892_v33  ;;  %1512 = vmatpush3.msra.mxu1 %v844_v14  ;;  %v595_v58 = vpop.f32.mrf.mxu0 }
  0xf9   : > { %1547 = vmatpush3.msra.mxu0 %v876_v34  ;;  %1513 = vmatprep.subr.mxu1 %v859_v35  ;;  %v918_v35 = vld [vmem:[%s2642_s3 + $0x278] sm:$0xff] }
  0xfa   : > { %1548 = vmatprep.subr.mxu0 %v891_v36  ;;  %1514 = vmatpush3.msra.mxu1 %v843_v37  ;;  %v950_v36 = vld [vmem:[%s2642_s3 + $0x378] sm:$0xff] }
  0xfb   : > { %1549 = vmatpush3.msra.mxu0 %v875_v38  ;;  %1515 = vmatprep.subr.mxu1 %v858_v39  ;;  %v933_v38 = vld [vmem:[%s2642_s3 + $0x2f0] sm:$0xff] }
  0xfc   : > { %1550 = vmatprep.subr.mxu0 %v890_v40  ;;  %1516 = vmatpush3.msra.mxu1 %v842_v41  ;;  %v965_v39 = vld [vmem:[%s2642_s3 + $0x3f0] sm:$0xff] }
  0xfd   : > { %1551 = vmatpush3.msra.mxu0 %v874_v42  ;;  %1517 = vmatprep.subr.mxu1 %v857_v43  ;;  %v917_v40 = vld [vmem:[%s2642_s3 + $0x270] sm:$0xff]  ;;  %v932_v42 = vld [vmem:[%s2642_s3 + $0x2e8] sm:$0xff] }
  0xfe   : > { %1552 = vmatprep.subr.mxu0 %v889_v44  ;;  %1518 = vmatpush3.msra.mxu1 %v841_v45  ;;  %v949_v41 = vld [vmem:[%s2642_s3 + $0x370] sm:$0xff]  ;;  %v964_v45 = vld [vmem:[%s2642_s3 + $0x3e8] sm:$0xff] }
  0xff   : > { %1553 = vmatpush3.msra.mxu0 %v873_v46  ;;  %1519 = vmatprep.subr.mxu1 %v856_v47  ;;  %v916_v46 = vld [vmem:[%s2642_s3 + $0x268] sm:$0xff] }
 0x100   : > { %1554 = vmatprep.subr.mxu0 %v888_v48  ;;  %1520 = vmatpush3.msra.mxu1 %v840_v49  ;;  %v948_v47 = vld [vmem:[%s2642_s3 + $0x368] sm:$0xff]  ;;  %v931_v48 = vld [vmem:[%s2642_s3 + $0x2e0] sm:$0xff] }
 0x101   : > { %1555 = vmatpush3.msra.mxu0 %v872_v50  ;;  %1521 = vmatprep.subr.mxu1 %v855_v51  ;;  %v963_v49 = vld [vmem:[%s2642_s3 + $0x3e0] sm:$0xff] }
 0x102   : > { %1556 = vmatprep.subr.mxu0 %v887_v52  ;;  %1522 = vmatpush3.msra.mxu1 %v839_v53  ;;  %v599_v59 = vpop.f32.mrf.mxu0  ;;  %v915_v50 = vld [vmem:[%s2642_s3 + $0x260] sm:$0xff]  ;;  %v930_v52 = vld [vmem:[%s2642_s3 + $0x2d8] sm:$0xff] }
 0x103   : > { %1557 = vmatpush3.msra.mxu0 %v871_v54  ;;  %1561 = vmatprep.subr.mxu1 %v934_v55  ;;  %v947_v51 = vld [vmem:[%s2642_s3 + $0x360] sm:$0xff]  ;;  %v962_v53 = vld [vmem:[%s2642_s3 + $0x3d8] sm:$0xff] }
 0x104   : > { %1596 = vmatprep.subr.mxu0 %v966_v56  ;;  %v601_v0 = vpop.f32.mrf.mxu0  ;;  %v914_v54 = vld [vmem:[%s2642_s3 + $0x258] sm:$0xff]  ;;  %v929_v56 = vld [vmem:[%s2642_s3 + $0x2d0] sm:$0xff] }
 0x105   : > { %v946_v55 = vld [vmem:[%s2642_s3 + $0x358] sm:$0xff] }
 0x1a0   : > { %v670_v61 = vpop.f32.mrf.mxu1 }
 0x1a1   : > { %v671_v2 = vadd.f32 %v670_v61, %v593_v57  ;;  %v961_v57 = vld [vmem:[%s2642_s3 + $0x3d0] sm:$0xff]  ;;  %v960_v61 = vld [vmem:[%s2642_s3 + $0x3c8] sm:$0xff] }
 0x1a2   : > { %v672_v1 = vpop.f32.mrf.mxu1 }
 0x1a3   : > { %v673_v8 = vadd.f32 %v672_v1, %v595_v58  ;;  %v913_v58 = vld [vmem:[%s2642_s3 + $0x250] sm:$0xff]  ;;  %v959_v1 = vld [vmem:[%s2642_s3 + $0x3c0] sm:$0xff] }
 0x1a4   : > { %v676_v4 = vpop.f32.mrf.mxu1  ;;  %v780_v7 = vpop.f32.mrf.mxu0 }
 0x1a5   : > { %v791_v9 = vadd.f32 %v780_v7, %v671_v2  ;;  %v677_v13 = vadd.f32 %v676_v4, %v599_v59  ;;  %v945_v59 = vld [vmem:[%s2642_s3 + $0x350] sm:$0xff]  ;;  %v911_v2 = vld [vmem:[%s2642_s3 + $0x240] sm:$0xff]  ;;  %v926_v4 = vld [vmem:[%s2642_s3 + $0x2b8] sm:$0xff] }
 0x1a6   : > { %v678_v11 = vpop.f32.mrf.mxu1  ;;  %v782_v12 = vpop.f32.mrf.mxu0  ;;  %v958_v7 = vld [vmem:[%s2642_s3 + $0x3b8] sm:$0xff] }
 0x1a7   : > { %v807_v15 = vadd.f32 %v800_v3, %v791_v9  ;;  %v792_v16 = vadd.f32 %v782_v12, %v673_v8  ;;  %v679_v18 = vadd.f32 %v678_v11, %v601_v0  ;;  %v927_v0 = vld [vmem:[%s2642_s3 + $0x2c0] sm:$0xff]  ;;  %v910_v8 = vld [vmem:[%s2642_s3 + $0x238] sm:$0xff]  ;;  %v957_v11 = vld [vmem:[%s2642_s3 + $0x3b0] sm:$0xff] }
 0x1a8   : > { %v786_v17 = vpop.f32.mrf.mxu0  ;;  %v942_v9 = vld [vmem:[%s2642_s3 + $0x338] sm:$0xff]  ;;  %v909_v12 = vld [vmem:[%s2642_s3 + $0x230] sm:$0xff] }
 0x1a9   : > { %v808_v19 = vadd.f32 %v804_v10, %v792_v16  ;;  %v793_v20 = vadd.f32 %v786_v17, %v677_v13  ;;  %v811_v6 = vmax.f32 %v807_v15, 0.0  ;;  %v941_v13 = vld [vmem:[%s2642_s3 + $0x330] sm:$0xff]  ;;  %v924_v15 = vld [vmem:[%s2642_s3 + $0x2a8] sm:$0xff] }
 0x1aa   : > { %v788_v21 = vpop.f32.mrf.mxu0  ;;  %v956_v16 = vld [vmem:[%s2642_s3 + $0x3a8] sm:$0xff] }
 0x1ab   : > { %v812_v22 = vmax.f32 %v808_v19, 0.0  ;;  %v809_v23 = vadd.f32 %v800_v3, %v793_v20  ;;  %v794_v24 = vadd.f32 %v788_v21, %v679_v18  ;;  %v943_v3 = vld [vmem:[%s2642_s3 + $0x340] sm:$0xff]  ;;  %v908_v17 = vld [vmem:[%s2642_s3 + $0x228] sm:$0xff] }
 0x1ac   : > { %v940_v18 = vld [vmem:[%s2642_s3 + $0x328] sm:$0xff]  ;;  %v923_v19 = vld [vmem:[%s2642_s3 + $0x2a0] sm:$0xff] }
 0x1ad   : > { %v815_v25 = vmax.f32 %v811_v6, %v812_v22  ;;  %v810_v26 = vadd.f32 %v804_v10, %v794_v24  ;;  %v813_v28 = vmax.f32 %v809_v23, 0.0  ;;  %v925_v10 = vld [vmem:[%s2642_s3 + $0x2b0] sm:$0xff]  ;;  %v955_v20 = vld [vmem:[%s2642_s3 + $0x3a0] sm:$0xff]  ;;  %v922_v22 = vld [vmem:[%s2642_s3 + $0x298] sm:$0xff] }
 0x1ae   : > { %v907_v21 = vld [vmem:[%s2642_s3 + $0x220] sm:$0xff]  ;;  %v954_v23 = vld [vmem:[%s2642_s3 + $0x398] sm:$0xff] }
 0x1af   : > { %v818_v27 = vrot.slane %v815_v25, 1  ;;  %v814_v29 = vmax.f32 %v810_v26, 0.0  ;;  %v939_v6 = vld [vmem:[%s2642_s3 + $0x320] sm:$0xff]  ;;  %v906_v24 = vld [vmem:[%s2642_s3 + $0x218] sm:$0xff]  ;;  %v921_v26 = vld [vmem:[%s2642_s3 + $0x290] sm:$0xff] }
 0x1b1   : > { %v820_v30 = vmax.f32 %v815_v25, %v818_v27  ;;  %v816_v31 = vmax.f32 %v813_v28, %v814_v29  ;;  %v938_v25 = vld [vmem:[%s2642_s3 + $0x318] sm:$0xff]  ;;  %v953_v27 = vld [vmem:[%s2642_s3 + $0x390] sm:$0xff] }
 0x1b2   : > { %v905_v28 = vld [vmem:[%s2642_s3 + $0x210] sm:$0xff] }
 0x1b3   : > { %v822_v32 = vrot.slane %v816_v31, 1  ;;  %v826_v33 = vrot.slane %v820_v30, 2  ;;  %v830_v14 = vrot.slane %v820_v30, 6  ;;  %v828_v34 = vrot.slane %v820_v30, 4  ;;  %v937_v29 = vld [vmem:[%s2642_s3 + $0x310] sm:$0xff] }
 0x1b5   : > { %v2390_v37 = vmax.f32 %v816_v31, %v822_v32  ;;  %1032 = vmatprep.mubr.f32.mxu1 %v826_v33  ;;  %1102 = vmatprep.mubr.f32.mxu0 %v830_v14  ;;  %v952_v31 = vld [vmem:[%s2642_s3 + $0x388] sm:$0xff]  ;;  %v919_v14 = vld [vmem:[%s2642_s3 + $0x280] sm:$0xff] }
 0x1b6   : > { %1033 = vmatmul.mubr.f32.vlgmr.msra.gmra.mxu1 %v820_v30  ;;  %1103 = vmatmul.mubr.f32.vlgmr.msra.gmra.mxu0 %v828_v34  ;;  %v920_v30 = vld [vmem:[%s2642_s3 + $0x288] sm:$0xff]  ;;  %v951_v34 = vld [vmem:[%s2642_s3 + $0x380] sm:$0xff] }
 0x1b7   : > { %1562 = vmatpush3.msra.mxu1 %v918_v35  ;;  %1597 = vmatpush3.msra.mxu0 %v950_v36  ;;  %v833_v43 = vrot.slane %v2390_v37, 2  ;;  %v837_v44 = vrot.slane %v2390_v37, 6  ;;  %v904_v32 = vld [vmem:[%s2642_s3 + $0x208] sm:$0xff]  ;;  %v903_v35 = vld [vmem:[%s2642_s3 + $0x200] sm:$0xff] }
 0x1b8   : > { %1563 = vmatprep.subr.mxu1 %v933_v38  ;;  %1598 = vmatprep.subr.mxu0 %v965_v39  ;;  %v936_v33 = vld [vmem:[%s2642_s3 + $0x308] sm:$0xff]  ;;  %v935_v36 = vld [vmem:[%s2642_s3 + $0x300] sm:$0xff]  ;;  %v835_v38 = vrot.slane %v2390_v37, 4  ;;  %v1252_v39 = vld [vmem:[%s2644_s5 + $0x18] sm:$0xff] }
 0x1b9   : > { %1564 = vmatpush3.msra.mxu1 %v917_v40  ;;  %1599 = vmatpush3.msra.mxu0 %v949_v41  ;;  %v1251_v40 = vld [vmem:[%s2644_s5 + $0x10] sm:$0xff]  ;;  %v1249_v41 = vld [vmem:[%s2644_s5] sm:$0xff] }
 0x1ba   : > { %1565 = vmatprep.subr.mxu1 %v932_v42  ;;  %1172 = vmatprep.mubr.f32.mxu1 %v833_v43 }
 0x1bb   : > { %1600 = vmatprep.subr.mxu0 %v964_v45  ;;  %1242 = vmatprep.mubr.f32.mxu0 %v837_v44 }
 0x1bc   : > { %1566 = vmatpush3.msra.mxu1 %v916_v46  ;;  %1601 = vmatpush3.msra.mxu0 %v948_v47  ;;  %v967_v46 = vld [vmem:[%s2643_s4] sm:$0x1] }
 0x1bd   : > { %1567 = vmatprep.subr.mxu1 %v931_v48  ;;  %1602 = vmatprep.subr.mxu0 %v963_v49 }
 0x1be   : > { %1568 = vmatpush3.msra.mxu1 %v915_v50  ;;  %1603 = vmatpush3.msra.mxu0 %v947_v51 }
 0x1bf   : > { %1569 = vmatprep.subr.mxu1 %v930_v52  ;;  %1604 = vmatprep.subr.mxu0 %v962_v53 }
 0x1c0   : > { %1570 = vmatpush3.msra.mxu1 %v914_v54  ;;  %1605 = vmatpush3.msra.mxu0 %v946_v55 }
 0x1c1   : > { %1571 = vmatprep.subr.mxu1 %v929_v56  ;;  %1606 = vmatprep.subr.mxu0 %v961_v57 }
 0x1c2   : > { %1572 = vmatpush3.msra.mxu1 %v913_v58  ;;  %1607 = vmatpush3.msra.mxu0 %v945_v59  ;;  %v1253_v59 = vld [vmem:[%s2645_s6] sm:$0x1] }
 0x1c3   : > { %1573 = vmatprep.subr.mxu1 %v928_v60  ;;  %1608 = vmatprep.subr.mxu0 %v960_v61 }
 0x1c4   : > { %1574 = vmatpush3.msra.mxu1 %v912_v62  ;;  %1609 = vmatpush3.msra.mxu0 %v944_v63 }
 0x1c5   : > { %1575 = vmatprep.subr.mxu1 %v927_v0  ;;  %1610 = vmatprep.subr.mxu0 %v959_v1 }
 0x1c6   : > { %1576 = vmatpush3.msra.mxu1 %v911_v2  ;;  %1611 = vmatpush3.msra.mxu0 %v943_v3 }
 0x1c7   : > { %1577 = vmatprep.subr.mxu1 %v926_v4  ;;  %1612 = vmatprep.subr.mxu0 %v958_v7 }
 0x1c8   : > { %1578 = vmatpush3.msra.mxu1 %v910_v8  ;;  %1613 = vmatpush3.msra.mxu0 %v942_v9 }
 0x1c9   : > { %1579 = vmatprep.subr.mxu1 %v925_v10  ;;  %1614 = vmatprep.subr.mxu0 %v957_v11 }
 0x1ca   : > { %1580 = vmatpush3.msra.mxu1 %v909_v12  ;;  %1615 = vmatpush3.msra.mxu0 %v941_v13 }
 0x1cb   : > { %1581 = vmatprep.subr.mxu1 %v924_v15  ;;  %1616 = vmatprep.subr.mxu0 %v956_v16 }
 0x1cc   : > { %1582 = vmatpush3.msra.mxu1 %v908_v17  ;;  %1617 = vmatpush3.msra.mxu0 %v940_v18 }
 0x1cd   : > { %1583 = vmatprep.subr.mxu1 %v923_v19  ;;  %1618 = vmatprep.subr.mxu0 %v955_v20 }
 0x1ce   : > { %1584 = vmatpush3.msra.mxu1 %v907_v21  ;;  %1619 = vmatpush3.msra.mxu0 %v939_v6 }
 0x1cf   : > { %1585 = vmatprep.subr.mxu1 %v922_v22  ;;  %1620 = vmatprep.subr.mxu0 %v954_v23 }
 0x1d0   : > { %1586 = vmatpush3.msra.mxu1 %v906_v24  ;;  %1621 = vmatpush3.msra.mxu0 %v938_v25 }
 0x1d1   : > { %1587 = vmatprep.subr.mxu1 %v921_v26  ;;  %1622 = vmatprep.subr.mxu0 %v953_v27 }
 0x1d2   : > { %1588 = vmatpush3.msra.mxu1 %v905_v28  ;;  %1623 = vmatpush3.msra.mxu0 %v937_v29 }
 0x1d3   : > { %1589 = vmatprep.subr.mxu1 %v920_v30  ;;  %1624 = vmatprep.subr.mxu0 %v952_v31 }
 0x1d4   : > { %1590 = vmatpush3.msra.mxu1 %v904_v32  ;;  %1625 = vmatpush3.msra.mxu0 %v936_v33 }
 0x1d5   : > { %1591 = vmatprep.subr.mxu1 %v919_v14  ;;  %1626 = vmatprep.subr.mxu0 %v951_v34 }
 0x1d6   : > { %1592 = vmatpush3.msra.mxu1 %v903_v35  ;;  %1627 = vmatpush3.msra.mxu0 %v935_v36 }
 0x1d7   : > { %1173 = vmatmul.mubr.f32.vlgmr.msra.gmra.mxu1 %v2390_v37  ;;  %1243 = vmatmul.mubr.f32.vlgmr.msra.gmra.mxu0 %v835_v38  ;;  %v1250_v37 = vld [vmem:[%s2644_s5 + $0x8] sm:$0xff] }
 0x1d8   : > { %1650 = vmatprep.subr.mxu1 %v1764_v5  ;;  %1658 = vmatprep.mubr.msk.f32.mxu1 %vm1765_vm5, %v1764_v5 }
 0x1d9   : > { %1651 = vmatpush3.msra.mxu1 %v1252_v39 }
 0x1da   : > { %1652 = vmatprep.subr.mxu1 %v1764_v5 }
 0x1db   : > { %1653 = vmatpush3.msra.mxu1 %v1251_v40 }
 0x1dc   : > { %1654 = vmatprep.subr.mxu1 %v1764_v5 }
 0x1dd   : > { %1655 = vmatpush3.msra.mxu1 %v1250_v37 }
 0x1de   : > { %1656 = vmatprep.subr.mxu1 %v1764_v5 }
 0x1df   : > { %1657 = vmatpush3.msra.mxu1 %v1249_v41 }
 0x276   : > { %v1523_v42 = vpop.f32.mrf.mxu1  ;;  %v1558_v44 = vpop.f32.mrf.mxu0 }
 0x278   : > { %v1524_v43 = vpop.f32.mrf.mxu1  ;;  %v1559_v47 = vpop.f32.mrf.mxu0 }
 0x279   : > { %v1525_v45 = vadd.f32 %v1524_v43, %v1523_v42  ;;  %v1560_v51 = vadd.f32 %v1559_v47, %v1558_v44 }
 0x27b   : > { %v1035_v48 = vadd.f32 %v1525_v45, %v967_v46 }
 0x27d   : > { %v1105_v54 = vadd.f32 %v1560_v51, %v1035_v48 }
 0x297   : > { %v1593_v49 = vpop.f32.mrf.mxu1  ;;  %v1628_v50 = vpop.f32.mrf.mxu0 }
 0x299   : > { %v1594_v52 = vpop.f32.mrf.mxu1  ;;  %v1629_v53 = vpop.f32.mrf.mxu0 }
 0x29a   : > { %v1595_v55 = vadd.f32 %v1594_v52, %v1593_v49  ;;  %v1630_v56 = vadd.f32 %v1629_v53, %v1628_v50 }
 0x29c   : > { %v1175_v5 = vadd.f32 %v1595_v55, %v1105_v54 }
 0x29e   : > { %v1245_v57 = vadd.f32 %v1630_v56, %v1175_v5 }
 0x2a0   : > { %v1248_v58 = vmax.f32 %v1245_v57, 0.0 }
 0x2a2   : > { %1659 = vmatmul.mubr.msk.f32.vlgmr.msra.gmra.mxu1 %vm1254_vm6, %v1248_v58 }
 0x362   : > { %v1324_v60 = vpop.f32.mrf.mxu1 }
 0x363   : > { %v1325_v61 = vadd.f32 %v1324_v60, %v1253_v59 }
 0x364   : > { %v1660_v62 = vpop.f32.mrf.mxu1 }
 0x365   : > { %1329 = vst.msk [vmem:[%s270_s20] sm:$0x1] %vm1328_vm7, %v1325_v61 }
 0x366   : > { %1715 = shalt.err (!%p1712_p3)
}
 0x367   : > { %s1716_s15 = scalar_lea.hbm %s2604_s29, 16  ;;  %s1720_s18 = scalar_lea.hbm %s2646_s7, 32 }
 0x368   : > { %p1717_p4 = scmp.ne.s32.totalorder %s2604_s29, %s1716_s15  ;;  %p1721_p9 = scmp.lt.s32.totalorder %s2604_s29, %s2646_s7 }
 0x369   : > { %p1722_p10 = scmp.lt.s32.totalorder %s1720_s18, %s1716_s15 }
 0x36a   : > { %p1718_p7 = pnand %p1717_p4, %p1845_p5 }
 0x36b   : > { %p1723_p11 = por %p1722_p10, %p1721_p9 }
 0x36c   : > { %p1719_p8 = pneg %p1718_p7 }
 0x36e   : > { %p1724_p12 = pnand %p1723_p11, %p1719_p8 }
 0x370   : > { %1727 = shalt.err (!%p1724_p12)
}
 0x371   : > { %1661 = dma.vmem_to_hbm [thread:$0]  (%p1845_p5), %s1344_s21, 16, %s2604_s29, %s1331_s8  }
 0x372 PF: > { %p1667_p13 = scmp.ge.s32.totalorder %s1762_s27, 2  ;;  %s1355_s22 = sand.u32 1, %s1750_s24  }
 0x373   : > { %s1356_s23 = scalar_lea.sflag [#allocation3], %s1355_s22 }
 0x374   : > { %p1664_p0 = pnand %p1667_p13, %p1849_p6 }
 0x376   : > { %p1665_p1 = pneg %p1664_p0 }
 0x378   : > { %1745 = dma.done.wait (%p1665_p1), %s1356_s23, 16  }
 0x379   : > { %1747 = vsyncadd (%p1665_p1), %s1356_s23, 4294967280  ;;  %p17_p2 = scmp.ge.s32.totalorder %s1832_s30, 4   ;;  %s2649_s24 = smov %s1754_s25 }
 0x37a   : > { %s2650_s25 = smov %s1758_s26  ;;  %s2651_s26 = smov %s1843_s10 }
 0x37b   : > { %s2652_s27 = smov %s1832_s30  ;;  %19 = sbr.rel (!%p17_p2) target bundleno = 3 (0x3), region = 85 }
 0x380   :  { %1360 = vsyncpa [#allocation3], 1 }
 0x381   :  { %1362 = vsyncpa [#allocation3 + $0x1], 1 }

</bundles_post_ra>
